<compile_context>
chip_gen: v5e
topology: v5e:2x2
jax: 0.10.0
libtpu: 0.0.40
codegen_flags: <defaults>
</compile_context>

<pallas_src>
import functools

import jax
import jax.numpy as jnp
from jax.experimental import pallas as pl
from jax.experimental.pallas import tpu as pltpu

LN_EPS = 1e-5                 # torch.nn.LayerNorm default eps
_INV_SQRT2 = 0.7071067811865476


def _round_up(x, m):
    return ((x + m - 1) // m) * m


def _decoder_rows(z, w1, b1, w2, b2):
    """Decoder math for one (rows, Zd) block -> (rows, Xd) normalized output."""
    z = z.astype(jnp.float32)

    # ---- Linear 1 (MXU) ----
    h = jnp.dot(z, w1, preferred_element_type=jnp.float32) + b1

    # ---- LayerNorm (elementwise_affine=False), biased variance like torch ----
    mu = jnp.mean(h, axis=-1, keepdims=True)
    hc = h - mu
    var = jnp.mean(hc * hc, axis=-1, keepdims=True)
    hn = hc * jax.lax.rsqrt(var + LN_EPS)

    # ---- GELU (exact, erf-based; matches nn.GELU default) ----
    g = 0.5 * hn * (1.0 + jax.lax.erf(hn * _INV_SQRT2))

    # ---- Linear 2 (MXU) ----
    ld = jnp.dot(g, w2, preferred_element_type=jnp.float32) + b2

    # ---- Softplus, numerically stable ----
    sp = jnp.maximum(ld, 0.0) + jnp.log1p(jnp.exp(-jnp.abs(ld)))

    # ---- Normalize by mean over last dim (softplus > 0 => denom > 0) ----
    denom = jnp.mean(sp, axis=-1, keepdims=True)
    # Exact reciprocal keeps the 1e-5 check tight; pl.reciprocal(approx=True)
    # would move this to the (idle) EUP slot if a looser tolerance is OK.
    return sp * pl.reciprocal(denom, approx=False)


def _decoder_kernel(*refs, pack, x_dim):
    """refs = (z_group_0..z_group_{pack-1}, w1, b1, w2, b2, [eye], out)."""
    z_refs = refs[:pack]
    w1_ref, b1_ref, w2_ref, b2_ref = refs[pack:pack + 4]
    if pack > 1:
        eye_ref, out_ref = refs[pack + 4], refs[pack + 5]
    else:
        out_ref = refs[pack + 4]

    w1 = w1_ref[...].astype(jnp.float32)
    b1 = b1_ref[...].astype(jnp.float32)
    w2 = w2_ref[...].astype(jnp.float32)
    b2 = b2_ref[...].astype(jnp.float32)
    # NOTE: if h_dim/x_dim ever grow large, feed the two main dots bf16
    # operands (keeping f32 accumulation) and single-buffer these constant
    # operands (pl.Buffered(1) / scratch) — negligible at these sizes.

    if pack == 1:
        out_ref[...] = _decoder_rows(z_refs[0][...], w1, b1, w2, b2).astype(out_ref.dtype)
        return

    # Lane-dense store: merge `pack` row-groups into one (tile, pack*Xd >= 128)
    # row via exact MXU lane-scatter (norm_p @ eye[p*Xd:(p+1)*Xd, :]); HIGHEST
    # precision makes multiply-by-{0,1} an (effectively) exact placement.
    merged = None
    for p in range(pack):
        norm_p = _decoder_rows(z_refs[p][...], w1, b1, w2, b2)
        sel = eye_ref[p * x_dim:(p + 1) * x_dim, :]           # (Xd, pack*Xd)
        part = jnp.dot(norm_p, sel,
                       precision=jax.lax.Precision.HIGHEST,
                       preferred_element_type=jnp.float32)
        merged = part if merged is None else merged + part
    out_ref[...] = merged.astype(out_ref.dtype)


def decoder_forward(z, w1, b1, w2, b2, *, tile_rows=512):
    """z: (B, Zd) float32; weights in (in, out) layout. Returns (B, Xd) float32."""
    B, Zd = z.shape
    Hd = w1.shape[1]
    Xd = w2.shape[1]

    # Lane-packing factor: group rows so each stored output row is >=128 lanes.
    pack = 128 // Xd if (Xd < 128 and 128 % Xd == 0) else 1

    # Packed-row tile per grid step: large for pipeline efficiency, clamped so
    # there are >=2 grid steps when the batch allows it, sublane-aligned to 8.
    rows = pl.cdiv(B, pack)
    tb = min(int(tile_rows), max(8, _round_up(pl.cdiv(rows, 2), 8)))
    tb = _round_up(tb, 8)
    n_steps = pl.cdiv(rows, tb)
    rows_pad = n_steps * tb
    b_pad = rows_pad * pack

    if b_pad != B:
        z = jnp.pad(z, ((0, b_pad - B), (0, 0)))   # padded rows are sliced off below

    # Row-group p holds original rows p, p+pack, p+2*pack, ... (pure strided view).
    z_parts = [z[p::pack] for p in range(pack)]     # each (rows_pad, Zd)
    b1_2d = b1.reshape(1, Hd)
    b2_2d = b2.reshape(1, Xd)

    def const_spec(shape):
        return pl.BlockSpec(shape, lambda i: (0, 0))

    in_specs = [pl.BlockSpec((tb, Zd), lambda i: (i, 0)) for _ in range(pack)]
    in_specs += [const_spec((Zd, Hd)), const_spec((1, Hd)),
                 const_spec((Hd, Xd)), const_spec((1, Xd))]
    operands = list(z_parts) + [w1, b1_2d, w2, b2_2d]
    if pack > 1:
        eye = jnp.eye(pack * Xd, dtype=jnp.float32)
        in_specs.append(const_spec((pack * Xd, pack * Xd)))
        operands.append(eye)

    out_packed = pl.pallas_call(
        functools.partial(_decoder_kernel, pack=pack, x_dim=Xd),
        out_shape=jax.ShapeDtypeStruct((rows_pad, pack * Xd), jnp.float32),
        grid_spec=pltpu.PrefetchScalarGridSpec(
            num_scalar_prefetch=0,
            grid=(n_steps,),
            in_specs=in_specs,
            out_specs=pl.BlockSpec((tb, pack * Xd), lambda i: (i, 0)),
        ),
        compiler_params=pltpu.CompilerParams(
            dimension_semantics=("parallel",),
        ),
    )(*operands)

    # Packed row i holds original rows [i*pack .. i*pack+pack-1] contiguously
    # along lanes, so this reshape is a pure row-major view; then drop padding.
    out = out_packed.reshape(rows_pad * pack, Xd)
    return out[:B]


def reference_forward(z, w1, b1, w2, b2):
    """Pure-JAX reference mirroring the PyTorch module semantics."""
    h = z @ w1 + b1
    mu = jnp.mean(h, axis=-1, keepdims=True)
    var = jnp.mean((h - mu) ** 2, axis=-1, keepdims=True)
    hn = (h - mu) / jnp.sqrt(var + LN_EPS)
    g = jax.nn.gelu(hn, approximate=False)
    ld = g @ w2 + b2
    sp = jax.nn.softplus(ld)
    return sp / jnp.mean(sp, axis=-1, keepdims=True)


if __name__ == "__main__":
    # Small shapes consistent with Decoder(z_dim, h_dim, x_dim).
    # B=10 is deliberately not a multiple of the tile to exercise padding.
    B, Z_DIM, H_DIM, X_DIM = 10, 16, 32, 64

    key = jax.random.PRNGKey(0)
    kz, k1, k2, k3, k4 = jax.random.split(key, 5)

    z = jax.random.normal(kz, (B, Z_DIM), dtype=jnp.float32)
    w1 = jax.random.normal(k1, (Z_DIM, H_DIM), dtype=jnp.float32) * (1.0 / jnp.sqrt(Z_DIM))
    b1 = jax.random.normal(k2, (H_DIM,), dtype=jnp.float32) * 0.01
    w2 = jax.random.normal(k3, (H_DIM, X_DIM), dtype=jnp.float32) * (1.0 / jnp.sqrt(H_DIM))
    b2 = jax.random.normal(k4, (X_DIM,), dtype=jnp.float32) * 0.01

    out = decoder_forward(z, w1, b1, w2, b2)
    out = jax.block_until_ready(out)

    ref = reference_forward(z, w1, b1, w2, b2)
    assert out.shape == (B, X_DIM)
    assert jnp.allclose(out, ref, atol=1e-5, rtol=1e-5), (
        f"max abs err = {jnp.max(jnp.abs(out - ref))}"
    )

    print("KERNEL_OK")
</pallas_src>

<mosaic_0001>
module attributes {stable_mosaic.version = 11 : i64} {
  func.func @_decoder_kernel(%arg0: i32, %arg1: memref<8x16xf32, #tpu.memory_space<vmem>>, %arg2: memref<8x16xf32, #tpu.memory_space<vmem>>, %arg3: memref<16x32xf32, #tpu.memory_space<vmem>>, %arg4: memref<1x32xf32, #tpu.memory_space<vmem>>, %arg5: memref<32x64xf32, #tpu.memory_space<vmem>>, %arg6: memref<1x64xf32, #tpu.memory_space<vmem>>, %arg7: memref<128x128xf32, #tpu.memory_space<vmem>>, %arg8: memref<8x128xf32, #tpu.memory_space<vmem>>) attributes {dimension_semantics = [#tpu.dimension_semantics<parallel>], iteration_bounds = array<i64: 1>, scalar_prefetch = 0 : i64, scratch_operands = 0 : i64, tpu.core_type = #tpu.core_type<tc>, window_params = [{transform_indices = @transform_0, window_bounds = array<i64: 8, 16>}, {transform_indices = @transform_1, window_bounds = array<i64: 8, 16>}, {pipeline_mode = #tpu.pipeline_mode<synchronous>, transform_indices = @transform_2, window_bounds = array<i64: 16, 32>}, {pipeline_mode = #tpu.pipeline_mode<synchronous>, transform_indices = @transform_3, window_bounds = array<i64: 1, 32>}, {pipeline_mode = #tpu.pipeline_mode<synchronous>, transform_indices = @transform_4, window_bounds = array<i64: 32, 64>}, {pipeline_mode = #tpu.pipeline_mode<synchronous>, transform_indices = @transform_5, window_bounds = array<i64: 1, 64>}, {pipeline_mode = #tpu.pipeline_mode<synchronous>, transform_indices = @transform_6, window_bounds = array<i64: 128, 128>}, {transform_indices = @transform_7, window_bounds = array<i64: 8, 128>}]} {
    %c0 = arith.constant 0 : index
    %c0_0 = arith.constant 0 : index
    %0 = vector.load %arg3[%c0, %c0_0] : memref<16x32xf32, #tpu.memory_space<vmem>>, vector<16x32xf32>
    %c0_1 = arith.constant 0 : index
    %c0_2 = arith.constant 0 : index
    %1 = vector.load %arg4[%c0_1, %c0_2] : memref<1x32xf32, #tpu.memory_space<vmem>>, vector<1x32xf32>
    %c0_3 = arith.constant 0 : index
    %c0_4 = arith.constant 0 : index
    %2 = vector.load %arg5[%c0_3, %c0_4] : memref<32x64xf32, #tpu.memory_space<vmem>>, vector<32x64xf32>
    %c0_5 = arith.constant 0 : index
    %c0_6 = arith.constant 0 : index
    %3 = vector.load %arg6[%c0_5, %c0_6] : memref<1x64xf32, #tpu.memory_space<vmem>>, vector<1x64xf32>
    %c0_7 = arith.constant 0 : index
    %c0_8 = arith.constant 0 : index
    %4 = vector.load %arg1[%c0_7, %c0_8] : memref<8x16xf32, #tpu.memory_space<vmem>>, vector<8x16xf32>
    %cst = arith.constant dense<0.000000e+00> : vector<8x32xf32>
    %5 = tpu.matmul %4, %0, %cst {dimension_numbers = #tpu.dot_dimension_numbers<[1], [0], [0], [1], [0, 0, 1, 1], [], []>} : vector<8x16xf32>, vector<16x32xf32>, vector<8x32xf32> -> vector<8x32xf32>
    %6 = vector.broadcast %1 : vector<1x32xf32> to vector<8x32xf32>
    %7 = arith.addf %5, %6 : vector<8x32xf32>
    %cst_9 = arith.constant dense<0.000000e+00> : vector<8xf32>
    %8 = vector.multi_reduction <add>, %7, %cst_9 [1] : vector<8x32xf32> to vector<8xf32>
    %9 = vector.shape_cast %8 : vector<8xf32> to vector<8x1xf32>
    %cst_10 = arith.constant 3.200000e+01 : f32
    %10 = vector.broadcast %cst_10 : f32 to vector<8x1xf32>
    %11 = arith.divf %9, %10 : vector<8x1xf32>
    %12 = vector.broadcast %11 : vector<8x1xf32> to vector<8x32xf32>
    %13 = arith.subf %7, %12 : vector<8x32xf32>
    %14 = arith.mulf %13, %13 : vector<8x32xf32>
    %cst_11 = arith.constant dense<0.000000e+00> : vector<8xf32>
    %15 = vector.multi_reduction <add>, %14, %cst_11 [1] : vector<8x32xf32> to vector<8xf32>
    %16 = vector.shape_cast %15 : vector<8xf32> to vector<8x1xf32>
    %cst_12 = arith.constant 3.200000e+01 : f32
    %17 = vector.broadcast %cst_12 : f32 to vector<8x1xf32>
    %18 = arith.divf %16, %17 : vector<8x1xf32>
    %cst_13 = arith.constant 9.99999974E-6 : f32
    %19 = vector.broadcast %cst_13 : f32 to vector<8x1xf32>
    %20 = arith.addf %18, %19 : vector<8x1xf32>
    %21 = math.rsqrt %20 : vector<8x1xf32>
    %22 = vector.broadcast %21 : vector<8x1xf32> to vector<8x32xf32>
    %23 = arith.mulf %13, %22 : vector<8x32xf32>
    %cst_14 = arith.constant 5.000000e-01 : f32
    %24 = vector.broadcast %cst_14 : f32 to vector<8x32xf32>
    %25 = arith.mulf %24, %23 : vector<8x32xf32>
    %cst_15 = arith.constant 0.707106769 : f32
    %26 = vector.broadcast %cst_15 : f32 to vector<8x32xf32>
    %27 = arith.mulf %23, %26 : vector<8x32xf32>
    %28 = math.erf %27 : vector<8x32xf32>
    %cst_16 = arith.constant 1.000000e+00 : f32
    %29 = vector.broadcast %cst_16 : f32 to vector<8x32xf32>
    %30 = arith.addf %29, %28 : vector<8x32xf32>
    %31 = arith.mulf %25, %30 : vector<8x32xf32>
    %cst_17 = arith.constant dense<0.000000e+00> : vector<8x64xf32>
    %32 = tpu.matmul %31, %2, %cst_17 {dimension_numbers = #tpu.dot_dimension_numbers<[1], [0], [0], [1], [0, 0, 1, 1], [], []>} : vector<8x32xf32>, vector<32x64xf32>, vector<8x64xf32> -> vector<8x64xf32>
    %33 = vector.broadcast %3 : vector<1x64xf32> to vector<8x64xf32>
    %34 = arith.addf %32, %33 : vector<8x64xf32>
    %cst_18 = arith.constant 0.000000e+00 : f32
    %35 = vector.broadcast %cst_18 : f32 to vector<8x64xf32>
    %36 = arith.maximumf %34, %35 : vector<8x64xf32>
    %37 = math.absf %34 : vector<8x64xf32>
    %cst_19 = arith.constant 0.000000e+00 : f32
    %38 = vector.broadcast %cst_19 : f32 to vector<8x64xf32>
    %39 = arith.subf %38, %37 : vector<8x64xf32>
    %40 = math.exp %39 : vector<8x64xf32>
    %41 = math.log1p %40 : vector<8x64xf32>
    %42 = arith.addf %36, %41 : vector<8x64xf32>
    %cst_20 = arith.constant dense<0.000000e+00> : vector<8xf32>
    %43 = vector.multi_reduction <add>, %42, %cst_20 [1] : vector<8x64xf32> to vector<8xf32>
    %44 = vector.shape_cast %43 : vector<8xf32> to vector<8x1xf32>
    %cst_21 = arith.constant 6.400000e+01 : f32
    %45 = vector.broadcast %cst_21 : f32 to vector<8x1xf32>
    %46 = arith.divf %44, %45 : vector<8x1xf32>
    %47 = tpu.reciprocal %46 : vector<8x1xf32> -> vector<8x1xf32>
    %48 = vector.broadcast %47 : vector<8x1xf32> to vector<8x64xf32>
    %49 = arith.mulf %42, %48 : vector<8x64xf32>
    %c0_22 = arith.constant 0 : index
    %c0_23 = arith.constant 0 : index
    %50 = vector.load %arg7[%c0_22, %c0_23] : memref<128x128xf32, #tpu.memory_space<vmem>>, vector<64x128xf32>
    %cst_24 = arith.constant dense<0.000000e+00> : vector<8x128xf32>
    %51 = tpu.matmul %49, %50, %cst_24 {dimension_numbers = #tpu.dot_dimension_numbers<[1], [0], [0], [1], [0, 0, 1, 1], [], []>, precision = #tpu.contract_precision<fp32>} : vector<8x64xf32>, vector<64x128xf32>, vector<8x128xf32> -> vector<8x128xf32>
    %c0_25 = arith.constant 0 : index
    %c0_26 = arith.constant 0 : index
    %52 = vector.load %arg2[%c0_25, %c0_26] : memref<8x16xf32, #tpu.memory_space<vmem>>, vector<8x16xf32>
    %cst_27 = arith.constant dense<0.000000e+00> : vector<8x32xf32>
    %53 = tpu.matmul %52, %0, %cst_27 {dimension_numbers = #tpu.dot_dimension_numbers<[1], [0], [0], [1], [0, 0, 1, 1], [], []>} : vector<8x16xf32>, vector<16x32xf32>, vector<8x32xf32> -> vector<8x32xf32>
    %54 = vector.broadcast %1 : vector<1x32xf32> to vector<8x32xf32>
    %55 = arith.addf %53, %54 : vector<8x32xf32>
    %cst_28 = arith.constant dense<0.000000e+00> : vector<8xf32>
    %56 = vector.multi_reduction <add>, %55, %cst_28 [1] : vector<8x32xf32> to vector<8xf32>
    %57 = vector.shape_cast %56 : vector<8xf32> to vector<8x1xf32>
    %cst_29 = arith.constant 3.200000e+01 : f32
    %58 = vector.broadcast %cst_29 : f32 to vector<8x1xf32>
    %59 = arith.divf %57, %58 : vector<8x1xf32>
    %60 = vector.broadcast %59 : vector<8x1xf32> to vector<8x32xf32>
    %61 = arith.subf %55, %60 : vector<8x32xf32>
    %62 = arith.mulf %61, %61 : vector<8x32xf32>
    %cst_30 = arith.constant dense<0.000000e+00> : vector<8xf32>
    %63 = vector.multi_reduction <add>, %62, %cst_30 [1] : vector<8x32xf32> to vector<8xf32>
    %64 = vector.shape_cast %63 : vector<8xf32> to vector<8x1xf32>
    %cst_31 = arith.constant 3.200000e+01 : f32
    %65 = vector.broadcast %cst_31 : f32 to vector<8x1xf32>
    %66 = arith.divf %64, %65 : vector<8x1xf32>
    %cst_32 = arith.constant 9.99999974E-6 : f32
    %67 = vector.broadcast %cst_32 : f32 to vector<8x1xf32>
    %68 = arith.addf %66, %67 : vector<8x1xf32>
    %69 = math.rsqrt %68 : vector<8x1xf32>
    %70 = vector.broadcast %69 : vector<8x1xf32> to vector<8x32xf32>
    %71 = arith.mulf %61, %70 : vector<8x32xf32>
    %cst_33 = arith.constant 5.000000e-01 : f32
    %72 = vector.broadcast %cst_33 : f32 to vector<8x32xf32>
    %73 = arith.mulf %72, %71 : vector<8x32xf32>
    %cst_34 = arith.constant 0.707106769 : f32
    %74 = vector.broadcast %cst_34 : f32 to vector<8x32xf32>
    %75 = arith.mulf %71, %74 : vector<8x32xf32>
    %76 = math.erf %75 : vector<8x32xf32>
    %cst_35 = arith.constant 1.000000e+00 : f32
    %77 = vector.broadcast %cst_35 : f32 to vector<8x32xf32>
    %78 = arith.addf %77, %76 : vector<8x32xf32>
    %79 = arith.mulf %73, %78 : vector<8x32xf32>
    %cst_36 = arith.constant dense<0.000000e+00> : vector<8x64xf32>
    %80 = tpu.matmul %79, %2, %cst_36 {dimension_numbers = #tpu.dot_dimension_numbers<[1], [0], [0], [1], [0, 0, 1, 1], [], []>} : vector<8x32xf32>, vector<32x64xf32>, vector<8x64xf32> -> vector<8x64xf32>
    %81 = vector.broadcast %3 : vector<1x64xf32> to vector<8x64xf32>
    %82 = arith.addf %80, %81 : vector<8x64xf32>
    %cst_37 = arith.constant 0.000000e+00 : f32
    %83 = vector.broadcast %cst_37 : f32 to vector<8x64xf32>
    %84 = arith.maximumf %82, %83 : vector<8x64xf32>
    %85 = math.absf %82 : vector<8x64xf32>
    %cst_38 = arith.constant 0.000000e+00 : f32
    %86 = vector.broadcast %cst_38 : f32 to vector<8x64xf32>
    %87 = arith.subf %86, %85 : vector<8x64xf32>
    %88 = math.exp %87 : vector<8x64xf32>
    %89 = math.log1p %88 : vector<8x64xf32>
    %90 = arith.addf %84, %89 : vector<8x64xf32>
    %cst_39 = arith.constant dense<0.000000e+00> : vector<8xf32>
    %91 = vector.multi_reduction <add>, %90, %cst_39 [1] : vector<8x64xf32> to vector<8xf32>
    %92 = vector.shape_cast %91 : vector<8xf32> to vector<8x1xf32>
    %cst_40 = arith.constant 6.400000e+01 : f32
    %93 = vector.broadcast %cst_40 : f32 to vector<8x1xf32>
    %94 = arith.divf %92, %93 : vector<8x1xf32>
    %95 = tpu.reciprocal %94 : vector<8x1xf32> -> vector<8x1xf32>
    %96 = vector.broadcast %95 : vector<8x1xf32> to vector<8x64xf32>
    %97 = arith.mulf %90, %96 : vector<8x64xf32>
    %c64 = arith.constant 64 : index
    %c0_41 = arith.constant 0 : index
    %98 = vector.load %arg7[%c64, %c0_41] : memref<128x128xf32, #tpu.memory_space<vmem>>, vector<64x128xf32>
    %cst_42 = arith.constant dense<0.000000e+00> : vector<8x128xf32>
    %99 = tpu.matmul %97, %98, %cst_42 {dimension_numbers = #tpu.dot_dimension_numbers<[1], [0], [0], [1], [0, 0, 1, 1], [], []>, precision = #tpu.contract_precision<fp32>} : vector<8x64xf32>, vector<64x128xf32>, vector<8x128xf32> -> vector<8x128xf32>
    %100 = arith.addf %51, %99 : vector<8x128xf32>
    %c0_43 = arith.constant 0 : index
    %c0_44 = arith.constant 0 : index
    %101 = vector.load %arg8[%c0_43, %c0_44] : memref<8x128xf32, #tpu.memory_space<vmem>>, vector<8x128xf32>
    tpu.vector_store %arg8[%c0_43, %c0_44], %100 {strides = array<i32>} : memref<8x128xf32, #tpu.memory_space<vmem>>, vector<8x128xf32>,
    return
  }
  func.func @transform_0(%arg0: i32) -> (i32, i32) {
    %c0_i32 = arith.constant 0 : i32
    %c0_i32_0 = arith.constant 0 : i32
    return %arg0, %c0_i32 : i32, i32
  }
  func.func @transform_1(%arg0: i32) -> (i32, i32) {
    %c0_i32 = arith.constant 0 : i32
    %c0_i32_0 = arith.constant 0 : i32
    return %arg0, %c0_i32 : i32, i32
  }
  func.func @transform_2(%arg0: i32) -> (i32, i32) {
    %c0_i32 = arith.constant 0 : i32
    %c0_i32_0 = arith.constant 0 : i32
    %c0_i32_1 = arith.constant 0 : i32
    return %c0_i32, %c0_i32_0 : i32, i32
  }
  func.func @transform_3(%arg0: i32) -> (i32, i32) {
    %c0_i32 = arith.constant 0 : i32
    %c0_i32_0 = arith.constant 0 : i32
    %c0_i32_1 = arith.constant 0 : i32
    return %c0_i32, %c0_i32_0 : i32, i32
  }
  func.func @transform_4(%arg0: i32) -> (i32, i32) {
    %c0_i32 = arith.constant 0 : i32
    %c0_i32_0 = arith.constant 0 : i32
    %c0_i32_1 = arith.constant 0 : i32
    return %c0_i32, %c0_i32_0 : i32, i32
  }
  func.func @transform_5(%arg0: i32) -> (i32, i32) {
    %c0_i32 = arith.constant 0 : i32
    %c0_i32_0 = arith.constant 0 : i32
    %c0_i32_1 = arith.constant 0 : i32
    return %c0_i32, %c0_i32_0 : i32, i32
  }
  func.func @transform_6(%arg0: i32) -> (i32, i32) {
    %c0_i32 = arith.constant 0 : i32
    %c0_i32_0 = arith.constant 0 : i32
    %c0_i32_1 = arith.constant 0 : i32
    return %c0_i32, %c0_i32_0 : i32, i32
  }
  func.func @transform_7(%arg0: i32) -> (i32, i32) {
    %c0_i32 = arith.constant 0 : i32
    %c0_i32_0 = arith.constant 0 : i32
    return %arg0, %c0_i32 : i32, i32
  }
}

</mosaic_0001>

<bundles_post_ra>
// kernel: tpu_custom_call.1
= control target key start
LH: loop header
LB: loop body
LE: loop exit
PB: predicated region body
PF: predicated region fallthrough
CT: control target
= control target key end

     0   :  { %12 = vsyncpa [#allocation3], 0  ;;  %s1485_s0 = inlined_call_operand.hbm [shape: f32[8,16], index: 0, kind: input, shape index: {}]   ;;  %s1486_s1 = inlined_call_operand.hbm [shape: f32[8,16], index: 1, kind: input, shape index: {}]   ;;  %s1487_s2 = inlined_call_operand.hbm [shape: f32[16,32], index: 2, kind: input, shape index: {}]   ;;  %s1488_s3 = inlined_call_operand.vmem [shape: f32[1,32], index: 3, kind: input, shape index: {}]   ;;  %s1489_s4 = inlined_call_operand.hbm [shape: f32[32,64], index: 4, kind: input, shape index: {}]   ;;  %s1490_s5 = inlined_call_operand.vmem [shape: f32[1,64], index: 5, kind: input, shape index: {}]   ;;  %s1491_s6 = inlined_call_operand.hbm [shape: f32[128,128], index: 6, kind: input, shape index: {}]   ;;  %s1492_s7 = inlined_call_operand.hbm [shape: f32[8,128], index: 7, kind: output, shape index: {}]  }
   0x1   :  { %13 = vsyncpa [#allocation6], 0 }
   0x2   :  { %14 = vsyncpa [#allocation9], 0  ;;  %s32_s26 = sshll.u32 %s1486_s1, 4  ;;  %s33_s26 = int_to_ptr.hbm [resolvable:$true] %s32_s26 }
   0x3   :  { %15 = vsyncpa [#allocation4], 0  ;;  %s1136_s27 = smov [#allocation5]   ;;  %s57_s8 = sshll.u32 %s1489_s4, 4  ;;  %s58_s8 = int_to_ptr.hbm [resolvable:$true] %s57_s8 }
   0x4   :  { %s34_s28 = sshll.u32 %s1136_s27, 4  ;;  %s1137_s9 = smov [#allocation8]   ;;  %s35_s28 = int_to_ptr.vmem [resolvable:$true] %s34_s28 }
   0x5   :  { %37 = dma.hbm_to_vmem [thread:$0]  %s33_s26, 128, %s35_s28, [#allocation6]  }
   0x6   :  { %s59_s10 = sshll.u32 %s1137_s9, 4  ;;  %s21_s13 = sshll.u32 %s1485_s0, 4  ;;  %s60_s10 = int_to_ptr.vmem [resolvable:$true] %s59_s10  ;;  %s22_s13 = int_to_ptr.hbm [resolvable:$true] %s21_s13 }
   0x7   :  { %s1138_s1 = smov 128   ;;  %s1139_s14 = smov 8  }
   0x8   :  { %65 = dma.hbm_to_vmem [thread:$0]  %s58_s8, 512, %s60_s10, [#allocation9], %s1138_s1, %s1138_s1, %s1139_s14  }
   0x9   :  { %s42_s17 = sshll.u32 %s1487_s2, 4  ;;  %s1140_s18 = smov [#allocation2]   ;;  %s43_s17 = int_to_ptr.hbm [resolvable:$true] %s42_s17 }
   0xa   :  { %s23_s19 = sshll.u32 %s1140_s18, 4  ;;  %s1141_s4 = smov [#allocation7]   ;;  %s24_s19 = int_to_ptr.vmem [resolvable:$true] %s23_s19 }
   0xb   :  { %26 = dma.hbm_to_vmem [thread:$0]  %s22_s13, 128, %s24_s19, [#allocation3]  }
   0xc   :  { %s44_s20 = sshll.u32 %s1141_s4, 4  ;;  %s72_s0 = sshll.u32 %s1491_s6, 4  ;;  %s45_s20 = int_to_ptr.vmem [resolvable:$true] %s44_s20  ;;  %s73_s0 = int_to_ptr.hbm [resolvable:$true] %s72_s0 }
   0xd   :  { %50 = dma.hbm_to_vmem [thread:$0]  %s43_s17, 256, %s45_s20, [#allocation6], %s1138_s1, %s1138_s1, %s1139_s14  }
   0xe   :  { %s1142_s23 = smov [#allocation10]  }
   0xf   :  { %s74_s24 = sshll.u32 %s1142_s23, 4  ;;  %s75_s24 = int_to_ptr.vmem [resolvable:$true] %s74_s24 }
  0x10   :  { %80 = dma.hbm_to_vmem [thread:$0]  %s73_s0, 2048, %s75_s24, [#allocation9], %s1138_s1, %s1138_s1, %s1139_s14  }
  0x11   :  { %1128 = dma.done.wait [#allocation3], 128  }
  0x12   :  { %1129 = vsyncadd [#allocation3], 4294967168 }
  0x13   :  { %1130 = dma.done.wait [#allocation6], 384  }
  0x14   :  { %1131 = vsyncadd [#allocation6], 4294966912 }
  0x15   :  { %1132 = dma.done.wait [#allocation9], 2560  }
  0x16   :  { %1133 = vsyncadd [#allocation9], 4294964736  ;;  %v102_v0 = vld [vmem:[#allocation7 + $0x8] sm:$0xff]  ;;  %v101_v1 = vld [vmem:[#allocation7] sm:$0xff]  ;;  %vm113_vm0 = vcmask 130048   ;;  %vm137_vm1 = vcmask 261120  }
  0x17   :  { %305 = vmatpush.msra.mxu2 %v102_v0  ;;  %v287_v2 = vld [vmem:[#allocation5] sm:$0xff]  ;;  %131 = vmatpush.msra.mxu0 %v102_v0  ;;  %v109_v3 = vld [vmem:[#allocation2] sm:$0xff]  ;;  %v1143_v11 = vmov 32.0   ;;  %v107_v28 = vld [vmem:[#allocation8 + $0x18] sm:$0xff]  ;;  %s930_s29 = sshll.u32 %s1492_s7, 4  ;;  %s931_s29 = int_to_ptr.hbm [resolvable:$true] %s930_s29 }
  0x18   :  { %v958_v4 = vld [vmem:[%s1488_s3] ss:$0 sm:$0xff]  ;;  %960 = vrcp.f32 %v1143_v11  ;;  %v106_v29 = vld [vmem:[#allocation8 + $0x10] sm:$0xff]  ;;  %392 = vmatpush.msra.mxu3 %v107_v28  ;;  %229 = vmatpush.msra.mxu1 %v107_v28  ;;  %v105_v31 = vld [vmem:[#allocation8 + $0x8] sm:$0xff] }
  0x19   :  { %306 = vmatpush.msra.mxu2 %v101_v1  ;;  %132 = vmatpush.msra.mxu0 %v101_v1  ;;  %v104_v33 = vld [vmem:[#allocation8] sm:$0xff] }
  0x1a   :  { %945 = vmatmul.msk.f32.vlgmr.msra.gmra.mxu2 %vm113_vm0, %v287_v2  ;;  %942 = vmatmul.msk.f32.vlgmr.msra.gmra.mxu0 %vm113_vm0, %v109_v3 }
  0x1b   :  { %393 = vmatpush.msra.mxu3 %v106_v29  ;;  %230 = vmatpush.msra.mxu1 %v106_v29 }
  0x1d   :  { %394 = vmatpush.msra.mxu3 %v105_v31  ;;  %231 = vmatpush.msra.mxu1 %v105_v31 }
  0x1e   :  { %v961_v12 = vpop.eup %960 }
  0x1f   :  { %v142_v13 = vmul.f32 32.0, %v961_v12  ;;  %vm146_vm2 = vweird.f32 %v961_v12  ;;  %395 = vmatpush.msra.mxu3 %v104_v33  ;;  %232 = vmatpush.msra.mxu1 %v104_v33 }
  0x21   :  { %v143_v14 = vsub.f32 1.0, %v142_v13 }
  0x23   :  { %v144_v15 = vmul.f32 %v961_v12, %v143_v14 }
  0x25   :  { %v145_v16 = vadd.f32 %v961_v12, %v144_v15 }
  0x27   :  { %v147_v17 = vsel %vm146_vm2, %v961_v12, %v145_v16  ;;  %vm252_vm2 = vcmask 523264  }
  0x97   :  { %v134_v7 = vpop.f32.mrf.mxu0 }
  0x98   :  { %v135_v9 = vadd.f32 %v958_v4, %v134_v7 }
  0x9a   :  { %v138_v10 = vsel %vm137_vm1, %v135_v9, 0.0 }
  0x9d   :  { %v308_v5 = vpop.f32.mrf.mxu2 }
  0x9e   :  { %v309_v6 = vadd.f32 %v958_v4, %v308_v5 }
  0xa0   :  { %v311_v8 = vsel %vm137_vm1, %v309_v6, 0.0 }
  0xa1   :  { %312 = vadd.xlane.f32.xlu0 %v311_v8 }
  0xa9   :  { %139 = vadd.xlane.f32.xlu0 %v138_v10 }
 0x114   :  { %v313_v18 = vpop.xlane.xlu0 %312 }
 0x115   :  { %v314_v19 = vmul.f32 %v313_v18, %v147_v17 }
 0x117   :  { %v315_v20 = vsub.f32 %v309_v6, %v314_v19 }
 0x119   :  { %v316_v21 = vmul.f32 %v315_v20, %v315_v20 }
 0x11b   :  { %v317_v22 = vsel %vm137_vm1, %v316_v21, 0.0 }
 0x11c   :  { %318 = vadd.xlane.f32.xlu1 %v317_v22  ;;  %v140_v23 = vpop.xlane.xlu0 %139 }
 0x11d   :  { %v148_v24 = vmul.f32 %v147_v17, %v140_v23 }
 0x11f   :  { %v149_v25 = vsub.f32 %v135_v9, %v148_v24 }
 0x121   :  { %v150_v26 = vmul.f32 %v149_v25, %v149_v25 }
 0x123   :  { %v151_v27 = vsel %vm137_vm1, %v150_v26, 0.0 }
 0x124   :  { %152 = vadd.xlane.f32.xlu1 %v151_v27 }
 0x18f   :  { %v319_v30 = vpop.xlane.xlu1 %318 }
 0x190   :  { %v320_v32 = vmul.f32 %v319_v30, %v147_v17 }
 0x192   :  { %v321_v34 = vadd.f32 1e-05, %v320_v32 }
 0x194   :  { %962 = vrsqrt.f32 %v321_v34  ;;  %vm328_vm4 = vweird.f32 %v321_v34 }
 0x197   :  { %v153_v35 = vpop.xlane.xlu1 %152 }
 0x198   :  { %v154_v36 = vmul.f32 %v153_v35, %v147_v17 }
 0x19a   :  { %v963_v37 = vpop.eup %962  ;;  %v155_v38 = vadd.f32 1e-05, %v154_v36 }
 0x19b   :  { %v323_v39 = vmul.f32 %v963_v37, %v321_v34  ;;  %vm329_vm3 = vweird.f32 %v963_v37 }
 0x19c   :  { %964 = vrsqrt.f32 %v155_v38  ;;  %vm330_vm5 = vmor %vm328_vm4, %vm329_vm3  ;;  %vm162_vm7 = vweird.f32 %v155_v38 }
 0x19d   :  { %v324_v40 = vmul.f32 %v963_v37, %v323_v39 }
 0x19f   :  { %v325_v41 = vmul.f32 0.5, %v324_v40 }
 0x1a1   :  { %v326_v42 = vsub.f32 1.5, %v325_v41 }
 0x1a2   :  { %v965_v43 = vpop.eup %964 }
 0x1a3   :  { %v327_v44 = vmul.f32 %v963_v37, %v326_v42  ;;  %v157_v45 = vmul.f32 %v965_v43, %v155_v38  ;;  %vm163_vm6 = vweird.f32 %v965_v43 }
 0x1a4   :  { %vm164_vm8 = vmor %vm162_vm7, %vm163_vm6 }
 0x1a5   :  { %v331_v46 = vsel %vm330_vm5, %v963_v37, %v327_v44  ;;  %v158_v47 = vmul.f32 %v965_v43, %v157_v45 }
 0x1a6   :  { %v1208_v48 = vmul.f32 %v331_v46, %v315_v20 }
 0x1a7   :  { %v159_v49 = vmul.f32 0.5, %v158_v47 }
 0x1a8   :  { %v1211_v50 = vmul.f32 0.70710677, %v1208_v48 }
 0x1a9   :  { %v160_v51 = vsub.f32 1.5, %v159_v49 }
 0x1aa   :  { %v335_v52 = vmul.f32 %v1211_v50, %v1211_v50 }
 0x1ab   :  { %v161_v53 = vmul.f32 %v965_v43, %v160_v51 }
 0x1ac   :  { %v336_v54 = vmin.f32 %v335_v52, 16.0 }
 0x1ad   :  { %v165_v55 = vsel %vm164_vm8, %v965_v43, %v161_v53 }
 0x1ae   :  { %v337_v56 = vmul.f32 2.1237322e-06, %v336_v54  ;;  %v348_v57 = vmul.f32 3.8918573e-05, %v336_v54  ;;  %v1215_v58 = vmul.f32 %v165_v55, %v149_v25 }
 0x1b0   :  { %v338_v59 = vadd.f32 0.00028619796, %v337_v56  ;;  %v349_v60 = vadd.f32 0.001143296, %v348_v57  ;;  %v1218_v61 = vmul.f32 0.70710677, %v1215_v58 }
 0x1b1   :  { %v333_v57 = vmul.f32 0.5, %v1208_v48  ;;  %v959_v48 = vld [vmem:[%s1490_s5] ss:$0 sm:$0xff]  ;;  %s1145_s5 = smov [#allocation11]  }
 0x1b2   :  { %v339_v62 = vmul.f32 %v338_v59, %v336_v54  ;;  %v350_v63 = vmul.f32 %v349_v60, %v336_v54  ;;  %v169_v0 = vmul.f32 %v1218_v61, %v1218_v61  ;;  %s928_s26 = sshll.u32 %s1145_s5, 4  ;;  %s929_s26 = int_to_ptr.vmem [resolvable:$true] %s928_s26 }
 0x1b4   :  { %v351_v1 = vadd.f32 0.014752088, %v350_v63  ;;  %v340_v2 = vadd.f32 0.0036580483, %v339_v62  ;;  %v170_v3 = vmin.f32 %v169_v0, 16.0 }
 0x1b6   :  { %v352_v4 = vmul.f32 %v351_v1, %v336_v54  ;;  %v171_v5 = vmul.f32 2.1237322e-06, %v170_v3  ;;  %v182_v6 = vmul.f32 3.8918573e-05, %v170_v3  ;;  %v341_v8 = vmul.f32 %v340_v2, %v336_v54 }
 0x1b8   :  { %v353_v7 = vadd.f32 0.112945676, %v352_v4  ;;  %v172_v9 = vadd.f32 0.00028619796, %v171_v5  ;;  %v183_v10 = vadd.f32 0.001143296, %v182_v6 }
 0x1b9   :  { %v342_v15 = vadd.f32 0.05243302, %v341_v8  ;;  %v167_v4 = vmul.f32 0.5, %v1215_v58  ;;  %v440_v58 = vld [vmem:[#allocation10 + $0x70] sm:$0xff] }
 0x1ba   :  { %v354_v11 = vmul.f32 %v353_v7, %v336_v54  ;;  %v173_v12 = vmul.f32 %v172_v9, %v170_v3  ;;  %v184_v13 = vmul.f32 %v183_v10, %v170_v3 }
 0x1bb   :  { %v343_v21 = vmul.f32 %v342_v15, %v336_v54  ;;  %v439_v15 = vld [vmem:[#allocation10 + $0x68] sm:$0xff] }
 0x1bc   :  { %v355_v14 = vadd.f32 0.4994258, %v354_v11  ;;  %v185_v16 = vadd.f32 0.014752088, %v184_v13  ;;  %v174_v18 = vadd.f32 0.0036580483, %v173_v12 }
 0x1bd   :  { %v344_v25 = vadd.f32 0.18741608, %v343_v21 }
 0x1be   :  { %v356_v17 = vmul.f32 %v355_v14, %v336_v54  ;;  %v186_v19 = vmul.f32 %v185_v16, %v170_v3  ;;  %v175_v23 = vmul.f32 %v174_v18, %v170_v3  ;;  %v441_v14 = vld [vmem:[#allocation10 + $0x78] sm:$0xff]  ;;  %v1236_v18 = vand.u32 4294901760, %v440_v58 }
 0x1bf   :  { %v345_v30 = vmul.f32 %v344_v25, %v336_v54 }
 0x1c0   :  { %v357_v20 = vadd.f32 1.0, %v356_v17  ;;  %v187_v22 = vadd.f32 0.112945676, %v186_v19  ;;  %v176_v27 = vadd.f32 0.05243302, %v175_v23  ;;  %v1234_v17 = vand.u32 4294901760, %v441_v14 }
 0x1c1   :  { %v346_v36 = vadd.f32 1.1283791, %v345_v30  ;;  %v1238_v19 = vand.u32 4294901760, %v439_v15 }
 0x1c2   :  { %966 = vrcp.f32 %v357_v20  ;;  %v188_v24 = vmul.f32 %v187_v22, %v170_v3  ;;  %v177_v33 = vmul.f32 %v176_v27, %v170_v3  ;;  %v369_v35 = vand.u32 2147483648, %v357_v20  ;;  %586 = vmatpush.msrb.mxu3 %v1234_v17  ;;  %454 = vmatpush.msrb.mxu0 %v1234_v17 }
 0x1c3   :  { %v367_v38 = vand.u32 2147483647, %v357_v20  ;;  %vm363_vm10 = vweird.f32 %v357_v20  ;;  %v347_v43 = vmul.f32 %v346_v36, %v1211_v50  ;;  %v1241_v21 = vsub.f32 %v441_v14, %v1234_v17 }
 0x1c4   :  { %v189_v26 = vadd.f32 0.4994258, %v188_v24  ;;  %v178_v39 = vadd.f32 0.18741608, %v177_v33  ;;  %v370_v41 = vor.u32 1.1754944e-38, %v369_v35  ;;  %v1244_v22 = vsub.f32 %v440_v58, %v1236_v18  ;;  %588 = vmatpush.msrb.mxu3 %v1236_v18  ;;  %456 = vmatpush.msrb.mxu0 %v1236_v18 }
 0x1c5   :  { %vm368_vm12 = vcmp.eq.f32.partialorder %v367_v38, 8.507059e+37  ;;  %v1247_v23 = vsub.f32 %v439_v15, %v1238_v19  ;;  %v488_v24 = vand.u32 4294901760, %v1241_v21  ;;  %549 = vmatpush.msrb.mxu1 %v1241_v21 }
 0x1c6   :  { %v190_v28 = vmul.f32 %v189_v26, %v170_v3  ;;  %v179_v46 = vmul.f32 %v178_v39, %v170_v3  ;;  %v494_v25 = vand.u32 4294901760, %v1244_v22  ;;  %590 = vmatpush.msrb.mxu3 %v1238_v19  ;;  %458 = vmatpush.msrb.mxu0 %v1238_v19 }
 0x1c7   :  { %v500_v26 = vand.u32 4294901760, %v1247_v23  ;;  %v489_v27 = vsub.f32 %v1241_v21, %v488_v24  ;;  %552 = vmatpush.msrb.mxu1 %v1244_v22 }
 0x1c8   :  { %v967_v29 = vpop.eup %966  ;;  %v191_v32 = vadd.f32 1.0, %v190_v28  ;;  %v180_v54 = vadd.f32 1.1283791, %v179_v46  ;;  %v495_v28 = vsub.f32 %v1244_v22, %v494_v25 }
 0x1c9   :  { %v359_v31 = vmul.f32 %v967_v29, %v357_v20  ;;  %vm364_vm9 = vweird.f32 %v967_v29  ;;  %555 = vmatpush.msrb.mxu1 %v1247_v23 }
 0x1ca   :  { %968 = vrcp.f32 %v191_v32  ;;  %vm365_vm11 = vmor %vm363_vm10, %vm364_vm9  ;;  %v203_v53 = vand.u32 2147483648, %v191_v32  ;;  %v201_v56 = vand.u32 2147483647, %v191_v32  ;;  %vm197_vm14 = vweird.f32 %v191_v32 }
 0x1cb   :  { %v360_v34 = vsub.f32 1.0, %v359_v31  ;;  %v181_v63 = vmul.f32 %v180_v54, %v1218_v61 }
 0x1cc   :  { %v204_v50 = vor.u32 1.1754944e-38, %v203_v53  ;;  %vm202_vm0 = vcmp.eq.f32.partialorder %v201_v56, 8.507059e+37 }
 0x1cd   :  { %v361_v37 = vmul.f32 %v967_v29, %v360_v34  ;;  %v496_v34 = vand.u32 4294901760, %v495_v28 }
 0x1cf   :  { %v362_v40 = vadd.f32 %v967_v29, %v361_v37 }
 0x1d0   :  { %v969_v42 = vpop.eup %968 }
 0x1d1   :  { %v366_v44 = vsel %vm365_vm11, %v967_v29, %v362_v40  ;;  %v193_v47 = vmul.f32 %v969_v42, %v191_v32  ;;  %vm198_vm13 = vweird.f32 %v969_v42  ;;  %v501_v29 = vsub.f32 %v1247_v23, %v500_v26 }
 0x1d2   :  { %v371_v45 = vsel %vm368_vm12, %v370_v41, %v366_v44  ;;  %vm199_vm15 = vmor %vm197_vm14, %vm198_vm13  ;;  %v490_v32 = vand.u32 4294901760, %v489_v27 }
 0x1d3   :  { %v372_v49 = vmul.f32 %v371_v45, %v347_v43  ;;  %v194_v51 = vsub.f32 1.0, %v193_v47  ;;  %v502_v36 = vand.u32 4294901760, %v501_v29  ;;  %v286_v29 = vld [vmem:[#allocation10 + $0x38] sm:$0xff] }
 0x1d4   :  { %491 = vmatpush.msrb.mxu2 %v490_v32 }
 0x1d5   :  { %v946_v52 = vclamps-f32 %v372_v49, 1.0  ;;  %v195_v55 = vmul.f32 %v969_v42, %v194_v51 }
 0x1d6   :  { %497 = vmatpush.msrb.mxu2 %v496_v34 }
 0x1d7   :  { %v375_v59 = vadd.f32 1.0, %v946_v52  ;;  %v196_v60 = vadd.f32 %v969_v42, %v195_v55 }
 0x1d8   :  { %503 = vmatpush.msrb.mxu2 %v502_v36 }
 0x1d9   :  { %v376_v62 = vmul.f32 %v375_v59, %v333_v57  ;;  %v200_v0 = vsel %vm199_vm15, %v969_v42, %v196_v60  ;;  %v438_v60 = vld [vmem:[#allocation10 + $0x60] sm:$0xff] }
 0x1da   :  { %v205_v1 = vsel %vm202_vm0, %v204_v50, %v200_v0  ;;  %v437_v50 = vld [vmem:[#allocation10 + $0x58] sm:$0xff] }
 0x1db   :  { %947 = vmatmul.msk.f32.vlgmr.msra.gmra.mxu3 %vm137_vm1, %v376_v62  ;;  %v206_v2 = vmul.f32 %v205_v1, %v181_v63  ;;  %v1279_v62 = vand.u32 4294901760, %v438_v60  ;;  %v1284_v0 = vand.u32 4294901760, %v437_v50  ;;  %v436_v1 = vld [vmem:[#allocation10 + $0x50] sm:$0xff] }
 0x1dd   :  { %v943_v3 = vclamps-f32 %v206_v2, 1.0  ;;  %v1282_v63 = vsub.f32 %v438_v60, %v1279_v62  ;;  %592 = vmatpush.msrb.mxu3 %v1279_v62  ;;  %460 = vmatpush.msrb.mxu0 %v1279_v62 }
 0x1df   :  { %v209_v5 = vadd.f32 1.0, %v943_v3  ;;  %v506_v2 = vand.u32 4294901760, %v1282_v63  ;;  %v1290_v3 = vsub.f32 %v437_v50, %v1284_v0  ;;  %594 = vmatpush.msrb.mxu3 %v1284_v0  ;;  %558 = vmatpush.msrb.mxu1 %v1282_v63 }
 0x1e0   :  { %462 = vmatpush.msrb.mxu0 %v1284_v0 }
 0x1e1   :  { %v210_v6 = vmul.f32 %v209_v5, %v167_v4  ;;  %v1292_v4 = vand.u32 4294901760, %v436_v1  ;;  %v435_v5 = vld [vmem:[#allocation10 + $0x48] sm:$0xff]  ;;  %561 = vmatpush.msrb.mxu1 %v1290_v3 }
 0x1e3   :  { %944 = vmatmul.msk.f32.vlgmr.msra.gmra.mxu1 %vm137_vm1, %v210_v6  ;;  %v507_v6 = vsub.f32 %v1282_v63, %v506_v2  ;;  %596 = vmatpush.msrb.mxu3 %v1292_v4 }
 0x1e4   :  { %464 = vmatpush.msrb.mxu0 %v1292_v4 }
 0x25e   :  { %v397_v7 = vpop.f32.mrf.mxu3 }
 0x25f   :  { %v398_v8 = vadd.f32 %v959_v48, %v397_v7  ;;  %v1300_v7 = vsub.f32 %v436_v1, %v1292_v4 }
 0x260   :  { %v234_v9 = vpop.f32.mrf.mxu1 }
 0x261   :  { %v401_v61 = vand.u32 2147483647, %v398_v8  ;;  %v1231_v10 = vadd.f32 %v959_v48, %v234_v9  ;;  %v400_v45 = vmax.f32 %v398_v8, 0.0  ;;  %v512_v48 = vand.u32 4294901760, %v1290_v3  ;;  %564 = vmatpush.msrb.mxu1 %v1300_v7 }
 0x262   :  { %v1302_v8 = vand.u32 4294901760, %v435_v5  ;;  %v508_v9 = vand.u32 4294901760, %v507_v6 }
 0x263   :  { %v402_v11 = vsub.f32 0.0, %v401_v61  ;;  %v238_v12 = vand.u32 2147483647, %v1231_v10  ;;  %v237_v56 = vmax.f32 %v1231_v10, 0.0  ;;  %v434_v61 = vld [vmem:[#allocation10 + $0x40] sm:$0xff]  ;;  %v513_v10 = vsub.f32 %v1290_v3, %v512_v48 }
 0x264   :  { %598 = vmatpush.msrb.mxu3 %v1302_v8  ;;  %466 = vmatpush.msrb.mxu0 %v1302_v8 }
 0x265   :  { %v403_v13 = vmul.f32 1.442695, %v402_v11  ;;  %v239_v16 = vsub.f32 0.0, %v238_v12  ;;  %v518_v11 = vand.u32 4294901760, %v1300_v7  ;;  %v1310_v12 = vsub.f32 %v435_v5, %v1302_v8  ;;  %509 = vmatpush.msrb.mxu2 %v508_v9 }
 0x266   :  { %v514_v14 = vand.u32 4294901760, %v513_v10 }
 0x267   :  { %970 = vpow2.f32 %v403_v13  ;;  %v240_v20 = vmul.f32 1.442695, %v239_v16  ;;  %v1314_v13 = vand.u32 4294901760, %v434_v61  ;;  %v519_v58 = vsub.f32 %v1300_v7, %v518_v11  ;;  %567 = vmatpush.msrb.mxu1 %v1310_v12 }
 0x268   :  { %v524_v15 = vand.u32 4294901760, %v1310_v12  ;;  %v1144_v16 = vmov 64.0   ;;  %515 = vmatpush.msrb.mxu2 %v514_v14 }
 0x269   :  { %972 = vpow2.f32 %v240_v20  ;;  %v1321_v20 = vsub.f32 %v434_v61, %v1314_v13  ;;  %600 = vmatpush.msrb.mxu3 %v1314_v13  ;;  %468 = vmatpush.msrb.mxu0 %v1314_v13  ;;  %v520_v27 = vand.u32 4294901760, %v519_v58 }
 0x26a   :  { %v525_v28 = vsub.f32 %v1310_v12, %v524_v15 }
 0x26b   :  { %619 = vmatpush.msra.mxu0 %v488_v24  ;;  %570 = vmatpush.msrb.mxu1 %v1321_v20  ;;  %v284_v24 = vld [vmem:[#allocation10 + $0x28] sm:$0xff] }
 0x26c   :  { %521 = vmatpush.msrb.mxu2 %v520_v27  ;;  %v526_v32 = vand.u32 4294901760, %v525_v28 }
 0x26d   :  { %v971_v30 = vpop.eup %970  ;;  %623 = vmatpush.msra.mxu0 %v494_v25 }
 0x26e   :  { %v405_v31 = vadd.f32 1.0, %v971_v30  ;;  %v408_v33 = vmul.f32 -0.5, %v971_v30  ;;  %v411_v40 = vand.u32 2147483647, %v971_v30  ;;  %527 = vmatpush.msrb.mxu2 %v526_v32 }
 0x26f   :  { %v973_v35 = vpop.eup %972  ;;  %627 = vmatpush.msra.mxu0 %v500_v26 }
 0x270   :  { %974 = vlog2.f32 %v405_v31  ;;  %v242_v37 = vadd.f32 1.0, %v973_v35  ;;  %v409_v38 = vadd.f32 1.0, %v408_v33  ;;  %v245_v39 = vmul.f32 -0.5, %v973_v35  ;;  %v285_v33 = vld [vmem:[#allocation10 + $0x30] sm:$0xff] }
 0x271   :  { %vm412_vm1 = vcmp.lt.f32.partialorder %v411_v40, 0.0004427343  ;;  %v248_v46 = vand.u32 2147483647, %v973_v35  ;;  %v1331_v31 = vand.u32 4294901760, %v286_v29  ;;  %v1342_v21 = vand.u32 4294901760, %v285_v33  ;;  %631 = vmatpush.msra.mxu0 %v506_v2 }
 0x272   :  { %976 = vlog2.f32 %v242_v37  ;;  %v410_v43 = vmul.f32 %v971_v30, %v409_v38  ;;  %v246_v44 = vadd.f32 1.0, %v245_v39  ;;  %v530_v30 = vand.u32 4294901760, %v1321_v20  ;;  %v283_v39 = vld [vmem:[#allocation10 + $0x20] sm:$0xff] }
 0x273   :  { %vm249_vm3 = vcmp.lt.f32.partialorder %v248_v46, 0.0004427343  ;;  %978 = vrcp.f32 %v1144_v16  ;;  %694 = vmatpush.msra.mxu1 %v1331_v31  ;;  %v1351_v37 = vsub.f32 %v285_v33, %v1342_v21  ;;  %v1353_v38 = vand.u32 4294901760, %v284_v24  ;;  %635 = vmatpush.msra.mxu0 %v512_v48  ;;  %v279_v2 = vld [vmem:[#allocation10] sm:$0xff] }
 0x274   :  { %v247_v53 = vmul.f32 %v973_v35, %v246_v44  ;;  %v531_v34 = vsub.f32 %v1321_v20, %v530_v30  ;;  %v1340_v35 = vsub.f32 %v286_v29, %v1331_v31  ;;  %v1407_v48 = vand.u32 4294901760, %v279_v2 }
 0x275   :  { %696 = vmatpush.msra.mxu1 %v1342_v21  ;;  %v734_v26 = vand.u32 4294901760, %v1351_v37  ;;  %v1361_v40 = vsub.f32 %v284_v24, %v1353_v38  ;;  %639 = vmatpush.msra.mxu0 %v518_v11 }
 0x276   :  { %v975_v41 = vpop.eup %974  ;;  %v532_v22 = vand.u32 4294901760, %v531_v34  ;;  %v728_v25 = vand.u32 4294901760, %v1340_v35  ;;  %v1422_v10 = vsub.f32 %v279_v2, %v1407_v48 }
 0x277   :  { %v407_v42 = vmul.f32 0.6931472, %v975_v41  ;;  %v1363_v41 = vand.u32 4294901760, %v283_v39  ;;  %698 = vmatpush.msra.mxu1 %v1353_v38  ;;  %v740_v46 = vand.u32 4294901760, %v1361_v40  ;;  %643 = vmatpush.msra.mxu0 %v524_v15 }
 0x278   :  { %v977_v47 = vpop.eup %976  ;;  %533 = vmatpush.msrb.mxu2 %v532_v22  ;;  %v729_v23 = vsub.f32 %v1340_v35, %v728_v25  ;;  %v770_v14 = vand.u32 4294901760, %v1422_v10 }
 0x279   :  { %v413_v49 = vsel %vm412_vm1, %v410_v43, %v407_v42  ;;  %v244_v52 = vmul.f32 0.6931472, %v977_v47  ;;  %v1347_v36 = vpop.eup %978  ;;  %v282_v43 = vld [vmem:[#allocation10 + $0x18] sm:$0xff]  ;;  %v1373_v47 = vsub.f32 %v283_v39, %v1363_v41  ;;  %700 = vmatpush.msra.mxu1 %v1363_v41  ;;  %647 = vmatpush.msra.mxu0 %v530_v30 }
 0x27a   :  { %v1270_v51 = vadd.f32 %v413_v49, %v400_v45  ;;  %v257_v42 = vmul.f32 64.0, %v1347_v36  ;;  %662 = vmatpush.msra.mxu2 %v1234_v17  ;;  %v730_v44 = vand.u32 4294901760, %v729_v23  ;;  %v735_v45 = vsub.f32 %v1351_v37, %v734_v26 }
 0x27b   :  { %v250_v55 = vsel %vm249_vm3, %v247_v53, %v244_v52  ;;  %v1377_v49 = vand.u32 4294901760, %v282_v43  ;;  %v281_v52 = vld [vmem:[#allocation10 + $0x10] sm:$0xff]  ;;  %v741_v53 = vsub.f32 %v1361_v40, %v740_v46  ;;  %vm261_vm4 = vweird.f32 %v1347_v36 }
 0x27c   :  { %v415_v54 = vsel %vm252_vm2, %v1270_v51, 0.0  ;;  %v1275_v57 = vadd.f32 %v250_v55, %v237_v56  ;;  %664 = vmatpush.msra.mxu2 %v1236_v18  ;;  %731 = vmatpush.msra.mxu3 %v730_v44  ;;  %v736_v17 = vand.u32 4294901760, %v735_v45  ;;  %v1383_v55 = vand.u32 4294901760, %v281_v52  ;;  %v280_v18 = vld [vmem:[#allocation10 + $0x8] sm:$0xff] }
 0x27d   :  { %416 = vadd.xlane.f32.xlu2 %v415_v54  ;;  %v746_v54 = vand.u32 4294901760, %v1373_v47  ;;  %v258_v56 = vsub.f32 1.0, %v257_v42  ;;  %702 = vmatpush.msra.mxu1 %v1377_v49  ;;  %v742_v60 = vand.u32 4294901760, %v741_v53  ;;  %v1396_v1 = vand.u32 4294901760, %v280_v18 }
 0x27e   :  { %v253_v59 = vsel %vm252_vm2, %v1275_v57, 0.0  ;;  %666 = vmatpush.msra.mxu2 %v1238_v19  ;;  %737 = vmatpush.msra.mxu3 %v736_v17  ;;  %v1394_v63 = vsub.f32 %v281_v52, %v1383_v55 }
 0x27f   :  { %v747_v50 = vsub.f32 %v1373_v47, %v746_v54  ;;  %704 = vmatpush.msra.mxu1 %v1383_v55  ;;  %v1405_v6 = vsub.f32 %v280_v18, %v1396_v1  ;;  %v259_v7 = vmul.f32 %v1347_v36, %v258_v56 }
 0x280   :  { %668 = vmatpush.msra.mxu2 %v1279_v62  ;;  %743 = vmatpush.msra.mxu3 %v742_v60  ;;  %v758_v5 = vand.u32 4294901760, %v1394_v63 }
 0x281   :  { %v748_v3 = vand.u32 4294901760, %v747_v50  ;;  %706 = vmatpush.msra.mxu1 %v1396_v1  ;;  %v764_v9 = vand.u32 4294901760, %v1405_v6  ;;  %v260_v58 = vadd.f32 %v1347_v36, %v259_v7 }
 0x282   :  { %670 = vmatpush.msra.mxu2 %v1284_v0  ;;  %v759_v61 = vsub.f32 %v1394_v63, %v758_v5 }
 0x283   :  { %749 = vmatpush.msra.mxu3 %v748_v3  ;;  %708 = vmatpush.msra.mxu1 %v1407_v48  ;;  %v765_v12 = vsub.f32 %v1405_v6, %v764_v9  ;;  %v262_v20 = vsel %vm261_vm4, %v1347_v36, %v260_v58 }
 0x284   :  { %672 = vmatpush.msra.mxu2 %v1292_v4  ;;  %v760_v0 = vand.u32 4294901760, %v759_v61  ;;  %v771_v4 = vsub.f32 %v1422_v10, %v770_v14 }
 0x285   :  { %254 = vadd.xlane.f32.xlu2 %v253_v59  ;;  %v1387_v59 = vsub.f32 %v282_v43, %v1377_v49  ;;  %v766_v15 = vand.u32 4294901760, %v765_v12 }
 0x286   :  { %674 = vmatpush.msra.mxu2 %v1302_v8  ;;  %v772_v16 = vand.u32 4294901760, %v771_v4 }
 0x287   :  { %v752_v19 = vand.u32 4294901760, %v1387_v59 }
 0x288   :  { %676 = vmatpush.msra.mxu2 %v1314_v13 }
 0x289   :  { %v753_v62 = vsub.f32 %v1387_v59, %v752_v19 }
 0x28b   :  { %v754_v11 = vand.u32 4294901760, %v753_v62 }
 0x28d   :  { %755 = vmatpush.msra.mxu3 %v754_v11 }
 0x28f   :  { %761 = vmatpush.msra.mxu3 %v760_v0 }
 0x291   :  { %767 = vmatpush.msra.mxu3 %v766_v15 }
 0x293   :  { %773 = vmatpush.msra.mxu3 %v772_v16 }
 0x2f0   :  { %v417_v27 = vpop.xlane.xlu2 %416 }
 0x2f1   :  { %v418_v28 = vmul.f32 %v417_v27, %v262_v20 }
 0x2f3   :  { %980 = vrcp.f32 %v418_v28  ;;  %v430_v34 = vand.u32 2147483648, %v418_v28  ;;  %v428_v22 = vand.u32 2147483647, %v418_v28  ;;  %vm424_vm6 = vweird.f32 %v418_v28 }
 0x2f5   :  { %v431_v36 = vor.u32 1.1754944e-38, %v430_v34  ;;  %vm429_vm8 = vcmp.eq.f32.partialorder %v428_v22, 8.507059e+37 }
 0x2f8   :  { %v255_v8 = vpop.xlane.xlu2 %254 }
 0x2f9   :  { %v981_v29 = vpop.eup %980  ;;  %v263_v30 = vmul.f32 %v262_v20, %v255_v8 }
 0x2fa   :  { %v420_v32 = vmul.f32 %v981_v29, %v418_v28  ;;  %vm425_vm5 = vweird.f32 %v981_v29 }
 0x2fb   :  { %982 = vrcp.f32 %v263_v30  ;;  %vm426_vm7 = vmor %vm424_vm6, %vm425_vm5  ;;  %v275_v52 = vand.u32 2147483648, %v263_v30  ;;  %v273_v53 = vand.u32 2147483647, %v263_v30  ;;  %vm269_vm10 = vweird.f32 %v263_v30 }
 0x2fc   :  { %v421_v33 = vsub.f32 1.0, %v420_v32 }
 0x2fd   :  { %v276_v50 = vor.u32 1.1754944e-38, %v275_v52  ;;  %vm274_vm12 = vcmp.eq.f32.partialorder %v273_v53, 8.507059e+37 }
 0x2fe   :  { %v422_v24 = vmul.f32 %v981_v29, %v421_v33 }
 0x300   :  { %v423_v13 = vadd.f32 %v981_v29, %v422_v24 }
 0x301   :  { %v983_v39 = vpop.eup %982 }
 0x302   :  { %v265_v23 = vmul.f32 %v983_v39, %v263_v30  ;;  %v427_v42 = vsel %vm426_vm7, %v981_v29, %v423_v13  ;;  %vm270_vm9 = vweird.f32 %v983_v39 }
 0x303   :  { %v432_v43 = vsel %vm429_vm8, %v431_v36, %v427_v42  ;;  %vm271_vm11 = vmor %vm269_vm10, %vm270_vm9 }
 0x304   :  { %v266_v44 = vsub.f32 1.0, %v265_v23  ;;  %v433_v45 = vmul.f32 %v432_v43, %v1270_v51 }
 0x306   :  { %v267_v17 = vmul.f32 %v983_v39, %v266_v44  ;;  %v443_v56 = vsel %vm252_vm2, %v433_v45, 0 }
 0x307   :  { %v469_v18 = vand.u32 4294901760, %v443_v56 }
 0x308   :  { %v268_v60 = vadd.f32 %v983_v39, %v267_v17 }
 0x309   :  { %535 = vmatmul.f32.vlgmr.msrb.gmra.mxu2 %v469_v18  ;;  %v470_v2 = vsub.f32 %v443_v56, %v469_v18 }
 0x30a   :  { %826 = vmatpush.msrb.mxu2 %v1331_v31  ;;  %v272_v3 = vsel %vm271_vm11, %v983_v39, %v268_v60 }
 0x30b   :  { %573 = vmatmul.f32.vlgmr.msrb.gmra.mxu1 %v470_v2  ;;  %v471_v7 = vand.u32 4294901760, %v470_v2  ;;  %v277_v51 = vsel %vm274_vm12, %v276_v50, %v272_v3 }
 0x30c   :  { %828 = vmatpush.msrb.mxu2 %v1342_v21  ;;  %859 = vmatpush.msrb.mxu1 %v728_v25  ;;  %v278_v62 = vmul.f32 %v277_v51, %v1275_v57 }
 0x30d   :  { %604 = vmatmul.f32.vlgmr.msrb.gmra.mxu3 %v471_v7  ;;  %v472_v61 = vsub.f32 %v470_v2, %v471_v7 }
 0x30e   :  { %830 = vmatpush.msrb.mxu2 %v1353_v38  ;;  %902 = vmatpush.msrb.mxu3 %v1331_v31  ;;  %v683_v11 = vsel %vm252_vm2, %v278_v62, 0 }
 0x30f   :  { %v473_v0 = vand.u32 4294901760, %v472_v61  ;;  %863 = vmatpush.msrb.mxu1 %v734_v26  ;;  %v709_v12 = vand.u32 4294901760, %v683_v11 }
 0x310   :  { %832 = vmatpush.msrb.mxu2 %v1363_v41  ;;  %904 = vmatpush.msrb.mxu3 %v1342_v21 }
 0x311   :  { %474 = vmatmul.f32.vlgmr.msrb.gmra.mxu0 %v473_v0  ;;  %678 = vmatmul.f32.vlgmr.msra.gmra.mxu2 %v469_v18  ;;  %v710_v57 = vsub.f32 %v683_v11, %v709_v12 }
 0x312   :  { %789 = vmatpush.msrb.mxu0 %v1340_v35  ;;  %834 = vmatpush.msrb.mxu2 %v1377_v49 }
 0x313   :  { %906 = vmatpush.msrb.mxu3 %v1353_v38  ;;  %867 = vmatpush.msrb.mxu1 %v740_v46  ;;  %v711_v31 = vand.u32 4294901760, %v710_v57 }
 0x314   :  { %792 = vmatpush.msrb.mxu0 %v1351_v37  ;;  %836 = vmatpush.msrb.mxu2 %v1383_v55 }
 0x315   :  { %908 = vmatpush.msrb.mxu3 %v1363_v41  ;;  %871 = vmatpush.msrb.mxu1 %v746_v54  ;;  %v712_v21 = vsub.f32 %v710_v57, %v711_v31 }
 0x316   :  { %775 = vmatmul.f32.vlgmr.msra.gmra.mxu3 %v709_v12  ;;  %795 = vmatpush.msrb.mxu0 %v1361_v40 }
 0x317   :  { %838 = vmatpush.msrb.mxu2 %v1396_v1  ;;  %910 = vmatpush.msrb.mxu3 %v1377_v49  ;;  %v713_v35 = vand.u32 4294901760, %v712_v21 }
 0x318   :  { %798 = vmatpush.msrb.mxu0 %v1373_v47  ;;  %875 = vmatpush.msrb.mxu1 %v752_v19 }
 0x319   :  { %840 = vmatpush.msrb.mxu2 %v1407_v48  ;;  %912 = vmatpush.msrb.mxu3 %v1383_v55 }
 0x31a   :  { %649 = vmatmul.f32.vlgmr.msra.gmra.mxu0 %v469_v18  ;;  %714 = vmatmul.f32.vlgmr.msra.gmra.mxu1 %v713_v35 }
 0x31b   :  { %844 = vmatmul.f32.vlgmr.msrb.gmra.mxu2 %v711_v31  ;;  %801 = vmatpush.msrb.mxu0 %v1387_v59 }
 0x31c   :  { %914 = vmatpush.msrb.mxu3 %v1396_v1  ;;  %879 = vmatpush.msrb.mxu1 %v758_v5 }
 0x31d   :  { %804 = vmatpush.msrb.mxu0 %v1394_v63 }
 0x31e   :  { %916 = vmatpush.msrb.mxu3 %v1407_v48  ;;  %883 = vmatpush.msrb.mxu1 %v764_v9 }
 0x31f   :  { %918 = vmatmul.f32.vlgmr.msrb.gmra.mxu3 %v709_v12  ;;  %807 = vmatpush.msrb.mxu0 %v1405_v6 }
 0x320   :  { %887 = vmatpush.msrb.mxu1 %v770_v14 }
 0x321   :  { %810 = vmatpush.msrb.mxu0 %v1422_v10 }
 0x322   :  { %813 = vmatmul.f32.vlgmr.msrb.gmra.mxu0 %v710_v57  ;;  %889 = vmatmul.f32.vlgmr.msrb.gmra.mxu1 %v709_v12 }
 0x388   :  { %v574_v26 = vpop.f32.mrf.mxu1 }
 0x38c   :  { %v536_v25 = vpop.f32.mrf.mxu2 }
 0x38e   :  { %v475_v37 = vpop.f32.mrf.mxu0 }
 0x38f   :  { %v537_v38 = vadd.f32 %v536_v25, %v475_v37 }
 0x390   :  { %v605_v40 = vpop.f32.mrf.mxu3 }
 0x391   :  { %v575_v41 = vadd.f32 %v574_v26, %v537_v38 }
 0x393   :  { %v606_v46 = vadd.f32 %v605_v40, %v575_v41 }
 0x394   :  { %v679_v47 = vpop.f32.mrf.mxu2 }
 0x397   :  { %v650_v49 = vpop.f32.mrf.mxu0  ;;  %v715_v55 = vpop.f32.mrf.mxu1 }
 0x398   :  { %v651_v54 = vadd.f32 %v650_v49, %v606_v46 }
 0x399   :  { %v776_v63 = vpop.f32.mrf.mxu3 }
 0x39a   :  { %v680_v59 = vadd.f32 %v679_v47, %v651_v54 }
 0x39c   :  { %v716_v1 = vadd.f32 %v715_v55, %v680_v59 }
 0x39e   :  { %v777_v19 = vadd.f32 %v776_v63, %v716_v1  ;;  %v845_v48 = vpop.f32.mrf.mxu2 }
 0x39f   :  { %v814_v5 = vpop.f32.mrf.mxu0  ;;  %v890_v10 = vpop.f32.mrf.mxu1 }
 0x3a0   :  { %v815_v6 = vadd.f32 %v814_v5, %v777_v19 }
 0x3a2   :  { %v846_v9 = vadd.f32 %v845_v48, %v815_v6  ;;  %v919_v58 = vpop.f32.mrf.mxu3 }
 0x3a4   :  { %v891_v14 = vadd.f32 %v890_v10, %v846_v9 }
 0x3a6   :  { %v920_v15 = vadd.f32 %v919_v58, %v891_v14 }
 0x3a8   :  { %922 = vst [vmem:[#allocation11] sm:$0xff] %v920_v15 }
 0x3a9   :  { %933 = dma.vmem_to_hbm [thread:$0]  %s929_s26, 128, %s931_s29, [#allocation4]  }
 0x3aa   :  { %1134 = dma.done.wait [#allocation4], 128  }
 0x3ab   :  { %1135 = vsyncadd [#allocation4], 4294967168 }
 0x3ac   :  { %938 = vsyncpa [#allocation3], 1 }
 0x3ad   :  { %939 = vsyncpa [#allocation6], 1 }
 0x3ae   :  { %940 = vsyncpa [#allocation9], 1 }
 0x3af   :  { %941 = vsyncpa [#allocation4], 1 }

</bundles_post_ra>
